<compile_context>
chip_gen: v6e
topology: v6e:2x2x1
jax: 0.10.0
libtpu: 0.0.40
codegen_flags: <defaults>
</compile_context>

<pallas_src>
import jax
import jax.numpy as jnp
from jax.experimental import pallas as pl
from jax.experimental.pallas import tpu as pltpu


def _round_up(a, b):
    return ((a + b - 1) // b) * b


def hybrid_embed_kernel(patches_ref, w1_ref, b1_ref, w2_ref, b2_ref, out_ref):
    # backbone conv (as matmul, bf16 MXU, f32 accumulate) + bias -> (TM, Cfp)
    feat = jnp.dot(patches_ref[...], w1_ref[...],
                   preferred_element_type=jnp.float32) + b1_ref[...]
    # projection Linear (bf16 MXU, f32 accumulate) + bias -> (TM, Ep)
    out = jnp.dot(feat.astype(w2_ref.dtype), w2_ref[...],
                  preferred_element_type=jnp.float32) + b2_ref[...]
    out_ref[...] = out.astype(out_ref.dtype)


def hybrid_embed(x, conv_w, conv_b, proj_w, proj_b, patch=4, tm_target=512,
                 out_dtype=jnp.bfloat16):
    """x: (B, C, H, W) NCHW float32.  Returns (B, N, E) in out_dtype."""
    B, C, H, W = x.shape
    Cf = conv_w.shape[0]
    E = proj_w.shape[0]
    Hf, Wf = H // patch, W // patch
    N = Hf * Wf
    M = B * N
    K1 = C * patch * patch

    # Lane-dense (multiple-of-128) padded dims for the *resident* weights and
    # the output; the streamed patches operand keeps its natural K1.
    Cfp = _round_up(Cf, 128)
    Ep = _round_up(E, 128)

    # Row tile: big tiles for large M (tm_target multiple of 256 fills the
    # 2x256^2 MXU M-dim), two tiles for small/medium M so a 2-TC chip (v7x)
    # still balances the grid; never below 16 rows (bf16 sublane packing).
    if M >= 2 * tm_target:
        TM = tm_target
    elif M > 256:
        TM = _round_up((M + 1) // 2, 128)
    else:
        TM = max(16, _round_up((M + 1) // 2, 16))
    M_pad = _round_up(M, TM)
    grid = (M_pad // TM,)
    # (For very large M the grid length may be odd; an even length is slightly
    #  better on v7x megacore but padding a full extra tile costs a serial
    #  step on v5e/v6e, so we leave it.)

    # --- glue (plain JAX): bf16 cast, patch extraction, padding -------------
    # Cast to bf16 *before* the NCHW -> patch-row shuffle so the extra HBM
    # round trip of the activation moves half the bytes.
    xb = x.astype(jnp.bfloat16)
    # patches flattened in (C, kh, kw) order to match PyTorch conv weight.flatten(1)
    patches = xb.reshape(B, C, Hf, patch, Wf, patch)
    patches = patches.transpose(0, 2, 4, 1, 3, 5).reshape(M, K1)
    if M_pad != M:
        patches = jnp.pad(patches, ((0, M_pad - M), (0, 0)))

    w1 = jnp.pad(conv_w.reshape(Cf, K1).T.astype(jnp.bfloat16),     # (K1, Cfp)
                 ((0, 0), (0, Cfp - Cf)))
    b1 = jnp.pad(conv_b.astype(jnp.float32), (0, Cfp - Cf)).reshape(1, Cfp)
    w2 = jnp.pad(proj_w.T.astype(jnp.bfloat16),                     # (Cfp, Ep)
                 ((0, Cfp - Cf), (0, Ep - E)))
    b2 = jnp.pad(proj_b.astype(jnp.float32), (0, Ep - E)).reshape(1, Ep)

    out_bytes = jnp.dtype(out_dtype).itemsize
    cost = pl.CostEstimate(
        flops=2 * M_pad * (K1 * Cfp + Cfp * Ep),
        transcendentals=0,
        bytes_accessed=(M_pad * K1 * 2 + K1 * Cfp * 2 + Cfp * 4
                        + Cfp * Ep * 2 + Ep * 4 + M_pad * Ep * out_bytes),
    )

    # Explicit VMEM budget (scoped default is only 16 MiB on v5e / 32 MiB on
    # v6e/v7x): double-buffered streamed tiles + (double-buffered) resident
    # weights + in-kernel f32 temporaries, 2x headroom, clamped to 64 MiB
    # (v7x physical per-TC).
    vmem_need = (2 * TM * K1 * 2 + 2 * TM * Ep * out_bytes
                 + 2 * (K1 * Cfp * 2 + Cfp * 4 + Cfp * Ep * 2 + Ep * 4)
                 + TM * Cfp * 4 + TM * Ep * 4)
    vmem_limit = int(min(max(2 * vmem_need, 32 * 1024 * 1024),
                         64 * 1024 * 1024))

    out = pl.pallas_call(
        hybrid_embed_kernel,
        out_shape=jax.ShapeDtypeStruct((M_pad, Ep), out_dtype),
        grid_spec=pltpu.PrefetchScalarGridSpec(
            num_scalar_prefetch=0,
            grid=grid,
            in_specs=[
                pl.BlockSpec((TM, K1), lambda i: (i, 0)),    # streamed, unpadded K1
                pl.BlockSpec((K1, Cfp), lambda i: (0, 0)),   # resident
                pl.BlockSpec((1, Cfp), lambda i: (0, 0)),    # resident
                pl.BlockSpec((Cfp, Ep), lambda i: (0, 0)),   # resident
                pl.BlockSpec((1, Ep), lambda i: (0, 0)),     # resident
            ],
            out_specs=pl.BlockSpec((TM, Ep), lambda i: (i, 0)),
        ),
        compiler_params=pltpu.CompilerParams(
            dimension_semantics=("parallel",),
            vmem_limit_bytes=vmem_limit),
        cost_estimate=cost,
    )(patches, w1, b1, w2, b2)

    return out[:M, :E].reshape(B, N, E)


if __name__ == "__main__":
    # Small shapes: B=2, in_chans=4, img 16x16, patch 4 -> Hf=Wf=4, N=16
    # feature_dim (backbone channels) = 32, embed_dim = 32
    B, C, H, W = 2, 4, 16, 16
    patch = 4
    feature_dim = 32
    embed_dim = 32

    key = jax.random.PRNGKey(0)
    kx, kcw, kcb, kpw, kpb = jax.random.split(key, 5)

    x = jax.random.normal(kx, (B, C, H, W), dtype=jnp.float32)
    conv_w = jax.random.normal(kcw, (feature_dim, C, patch, patch),
                               dtype=jnp.float32) * 0.05
    conv_b = jax.random.normal(kcb, (feature_dim,), dtype=jnp.float32) * 0.05
    proj_w = jax.random.normal(kpw, (embed_dim, feature_dim),
                               dtype=jnp.float32) * 0.05
    proj_b = jax.random.normal(kpb, (embed_dim,), dtype=jnp.float32) * 0.05

    out = hybrid_embed(x, conv_w, conv_b, proj_w, proj_b, patch=patch)
    out = jax.block_until_ready(out)

    # Pure-JAX f32 reference (conv via lax, then flatten/transpose/linear).
    feat = jax.lax.conv_general_dilated(
        x, conv_w, window_strides=(patch, patch), padding="VALID",
        dimension_numbers=("NCHW", "OIHW", "NCHW")) + conv_b[None, :, None, None]
    ref = feat.reshape(B, feature_dim, -1).transpose(0, 2, 1) @ proj_w.T + proj_b

    assert out.shape == (B, (H // patch) * (W // patch), embed_dim)
    assert out.dtype == jnp.bfloat16
    # bf16 MXU inputs + bf16 output (f32 accumulation) -> loosened tolerance
    # vs the f32 reference.
    err = jnp.max(jnp.abs(out.astype(jnp.float32) - ref))
    assert jnp.allclose(out.astype(jnp.float32), ref, atol=3e-2, rtol=3e-2), float(err)

    print("KERNEL_OK")
</pallas_src>

<mosaic_0001>
module attributes {stable_mosaic.version = 11 : i64} {
  func.func @hybrid_embed_kernel(%arg0: i32, %arg1: memref<16x64xbf16, #tpu.memory_space<vmem>>, %arg2: memref<64x128xbf16, #tpu.memory_space<vmem>>, %arg3: memref<1x128xf32, #tpu.memory_space<vmem>>, %arg4: memref<128x128xbf16, #tpu.memory_space<vmem>>, %arg5: memref<1x128xf32, #tpu.memory_space<vmem>>, %arg6: memref<16x128xbf16, #tpu.memory_space<vmem>>) attributes {dimension_semantics = [#tpu.dimension_semantics<parallel>], iteration_bounds = array<i64: 2>, scalar_prefetch = 0 : i64, scratch_operands = 0 : i64, tpu.core_type = #tpu.core_type<tc>, window_params = [{transform_indices = @transform_0, window_bounds = array<i64: 16, 64>}, {pipeline_mode = #tpu.pipeline_mode<synchronous>, transform_indices = @transform_1, window_bounds = array<i64: 64, 128>}, {pipeline_mode = #tpu.pipeline_mode<synchronous>, transform_indices = @transform_2, window_bounds = array<i64: 1, 128>}, {pipeline_mode = #tpu.pipeline_mode<synchronous>, transform_indices = @transform_3, window_bounds = array<i64: 128, 128>}, {pipeline_mode = #tpu.pipeline_mode<synchronous>, transform_indices = @transform_4, window_bounds = array<i64: 1, 128>}, {transform_indices = @transform_5, window_bounds = array<i64: 16, 128>}]} {
    %c0 = arith.constant 0 : index
    %c0_0 = arith.constant 0 : index
    %0 = vector.load %arg1[%c0, %c0_0] : memref<16x64xbf16, #tpu.memory_space<vmem>>, vector<16x64xbf16>
    %c0_1 = arith.constant 0 : index
    %c0_2 = arith.constant 0 : index
    %1 = vector.load %arg2[%c0_1, %c0_2] : memref<64x128xbf16, #tpu.memory_space<vmem>>, vector<64x128xbf16>
    %cst = arith.constant dense<0.000000e+00> : vector<16x128xf32>
    %2 = tpu.matmul %0, %1, %cst {dimension_numbers = #tpu.dot_dimension_numbers<[1], [0], [0], [1], [0, 0, 1, 1], [], []>} : vector<16x64xbf16>, vector<64x128xbf16>, vector<16x128xf32> -> vector<16x128xf32>
    %c0_3 = arith.constant 0 : index
    %c0_4 = arith.constant 0 : index
    %3 = vector.load %arg3[%c0_3, %c0_4] : memref<1x128xf32, #tpu.memory_space<vmem>>, vector<1x128xf32>
    %4 = vector.broadcast %3 : vector<1x128xf32> to vector<16x128xf32>
    %5 = arith.addf %2, %4 : vector<16x128xf32>
    %6 = arith.truncf %5 : vector<16x128xf32> to vector<16x128xbf16>
    %c0_5 = arith.constant 0 : index
    %c0_6 = arith.constant 0 : index
    %7 = vector.load %arg4[%c0_5, %c0_6] : memref<128x128xbf16, #tpu.memory_space<vmem>>, vector<128x128xbf16>
    %cst_7 = arith.constant dense<0.000000e+00> : vector<16x128xf32>
    %8 = tpu.matmul %6, %7, %cst_7 {dimension_numbers = #tpu.dot_dimension_numbers<[1], [0], [0], [1], [0, 0, 1, 1], [], []>} : vector<16x128xbf16>, vector<128x128xbf16>, vector<16x128xf32> -> vector<16x128xf32>
    %c0_8 = arith.constant 0 : index
    %c0_9 = arith.constant 0 : index
    %9 = vector.load %arg5[%c0_8, %c0_9] : memref<1x128xf32, #tpu.memory_space<vmem>>, vector<1x128xf32>
    %10 = vector.broadcast %9 : vector<1x128xf32> to vector<16x128xf32>
    %11 = arith.addf %8, %10 : vector<16x128xf32>
    %12 = arith.truncf %11 : vector<16x128xf32> to vector<16x128xbf16>
    %c0_10 = arith.constant 0 : index
    %c0_11 = arith.constant 0 : index
    %13 = vector.load %arg6[%c0_10, %c0_11] : memref<16x128xbf16, #tpu.memory_space<vmem>>, vector<16x128xbf16>
    tpu.vector_store %arg6[%c0_10, %c0_11], %12 {strides = array<i32>} : memref<16x128xbf16, #tpu.memory_space<vmem>>, vector<16x128xbf16>,
    return
  }
  func.func @transform_0(%arg0: i32) -> (i32, i32) {
    %c0_i32 = arith.constant 0 : i32
    %c0_i32_0 = arith.constant 0 : i32
    return %arg0, %c0_i32 : i32, i32
  }
  func.func @transform_1(%arg0: i32) -> (i32, i32) {
    %c0_i32 = arith.constant 0 : i32
    %c0_i32_0 = arith.constant 0 : i32
    %c0_i32_1 = arith.constant 0 : i32
    return %c0_i32, %c0_i32_0 : i32, i32
  }
  func.func @transform_2(%arg0: i32) -> (i32, i32) {
    %c0_i32 = arith.constant 0 : i32
    %c0_i32_0 = arith.constant 0 : i32
    %c0_i32_1 = arith.constant 0 : i32
    return %c0_i32, %c0_i32_0 : i32, i32
  }
  func.func @transform_3(%arg0: i32) -> (i32, i32) {
    %c0_i32 = arith.constant 0 : i32
    %c0_i32_0 = arith.constant 0 : i32
    %c0_i32_1 = arith.constant 0 : i32
    return %c0_i32, %c0_i32_0 : i32, i32
  }
  func.func @transform_4(%arg0: i32) -> (i32, i32) {
    %c0_i32 = arith.constant 0 : i32
    %c0_i32_0 = arith.constant 0 : i32
    %c0_i32_1 = arith.constant 0 : i32
    return %c0_i32, %c0_i32_0 : i32, i32
  }
  func.func @transform_5(%arg0: i32) -> (i32, i32) {
    %c0_i32 = arith.constant 0 : i32
    %c0_i32_0 = arith.constant 0 : i32
    return %arg0, %c0_i32 : i32, i32
  }
}

</mosaic_0001>

<bundles_post_ra>
// kernel: tpu_custom_call.1
= control target key start
LH: loop header
LB: loop body
LE: loop exit
PB: predicated region body
PF: predicated region fallthrough
CT: control target
= control target key end

     0   :  { %10 = vsyncpa [#allocation3], 0  ;;  %s1169_s0 = inlined_call_operand.hbm [shape: bf16[32,64], index: 0, kind: input, shape index: {}]   ;;  %s1170_s1 = inlined_call_operand.hbm [shape: bf16[64,128], index: 1, kind: input, shape index: {}]   ;;  %s1171_s2 = inlined_call_operand.vmem [shape: f32[1,128], index: 2, kind: input, shape index: {}]   ;;  %s1172_s3 = inlined_call_operand.hbm [shape: bf16[128,128], index: 3, kind: input, shape index: {}]   ;;  %s1173_s4 = inlined_call_operand.vmem [shape: f32[1,128], index: 4, kind: input, shape index: {}]   ;;  %s1174_s5 = inlined_call_operand.hbm [shape: bf16[32,128], index: 5, kind: output, shape index: {}]  }
   0x1   :  { %12 = vsyncpa [#allocation3 + $0x1], 0 }
   0x2   :  { %13 = vsyncpa [#allocation6], 0 }
   0x3   :  { %14 = vsyncpa [#allocation4], 0 }
   0x4   :  { %16 = vsyncpa [#allocation4 + $0x1], 0  ;;  %s962_s18 = smov 0   ;;  %s964_s19 = smov 0  }
   0x5   :  { %s966_s20 = smov 0   ;;  %s968_s21 = smov 0  }
   0x6 LB: > { %s983_s22 = sadd.s32 4294967295, %s920_s21   ;;  %s595_s23 = sadd.s32 4294967294, %s920_s21   ;;  %s920_s21 = sphi %s968_s21, %s1197_s21   ;;  %s916_s20 = sphi %s966_s20, %s1196_s20   ;;  %s912_s19 = sphi %s964_s19, %s1195_s19   ;;  %s908_s18 = sphi %s962_s18, %s1194_s18  }
   0x7   : > { %p42_p0 = scmp.ne.s32.totalorder %s912_s19, %s908_s18  ;;  %p1175_p1 = scmp.eq.s32.totalorder %s983_s22, 0 }
   0x8   : > { %p150_p2 = scmp.eq.s32.totalorder %s983_s22, 1  ;;  %p156_p3 = scmp.eq.s32.totalorder %s595_s23, 1 }
   0x9   : > { %p992_p4 = por %p1175_p1, %p42_p0  ;;  %p596_p5 = scmp.ge.s32.totalorder %s920_s21, 1 }
   0xa   : > { %p997_p6 = por %p156_p3, %p42_p0  ;;  %p163_p7 = scmp.lt.s32.totalorder %s920_s21, 3 }
   0xb   : > { %s1180_s24 = scalar_select %p992_p4, 1, 0 }
   0xc   : > { %s1181_s25 = scalar_select %p997_p6, 1, 0 }
   0xd   : > { %p1002_p8 = pnand %p596_p5, %p163_p7  ;;  %s922_s27 = smov [#allocation5]  }
   0xe   : > { %s175_s28 = sshll.u32 %s922_s27, 4  ;;  %s923_s30 = smov [#allocation7]   ;;  %s176_s28 = int_to_ptr.vmem [resolvable:$true] %s175_s28 }
   0xf   : > { %s1182_s26 = scalar_select %p1002_p8, 1, 0 }
  0x10   : > { %p698_p9 = pneg %p1002_p8  ;;  %s191_s6 = sshll.u32 %s923_s30, 4  ;;  %s192_s6 = int_to_ptr.vmem [resolvable:$true] %s191_s6 }
  0x11   : > { %s783_s7 = scalar_lea.vmem %s176_s28, 512  ;;  %p791_p5 = scmp.lt.s32.totalorder %s176_s28, %s176_s28 }
  0x12   : > { %p1011_p11 = pnand %p698_p9, %p1175_p1  ;;  %p784_p13 = scmp.ne.s32.totalorder %s176_s28, %s783_s7 }
  0x13   : > { %p792_p7 = scmp.lt.s32.totalorder %s783_s7, %s783_s7 }
  0x14   : > { %p774_p12 = pneg %p1011_p11 }
  0x15   : > { %p793_p10 = por %p792_p7, %p791_p5 }
  0x16   : > { %p786_p0 = pnand %p784_p13, %p774_p12 }
  0x18   : > { %p787_p3 = pneg %p786_p0 }
  0x1a   : > { %p794_p9 = pnand %p793_p10, %p787_p3 }
  0x1c   : > { %797 = shalt.err (!%p794_p9)
}
  0x1d   : > { %s1176_s8 = smov 64   ;;  %s925_s9 = smov 4  }
  0x1e   : > { %701 = dma.hbm_to_vmem [thread:$0]  (!%p1011_p11), %s1170_s1, 512, %s176_s28, [#allocation6], %s1176_s8, %s1176_s8, %s925_s9  }
  0x1f   : > { %s809_s12 = scalar_lea.vmem %s192_s6, 1024  ;;  %p817_p10 = scmp.lt.s32.totalorder %s192_s6, %s192_s6 }
  0x20   : > { %p810_p13 = scmp.ne.s32.totalorder %s192_s6, %s809_s12  ;;  %p818_p3 = scmp.lt.s32.totalorder %s809_s12, %s809_s12 }
  0x22   : > { %p812_p0 = pnand %p810_p13, %p774_p12  ;;  %p819_p7 = por %p818_p3, %p817_p10 }
  0x24   : > { %p813_p5 = pneg %p812_p0 }
  0x26   : > { %p820_p9 = pnand %p819_p7, %p813_p5 }
  0x28   : > { %823 = shalt.err (!%p820_p9)
}
  0x29   : > { %704 = dma.hbm_to_vmem [thread:$0]  (!%p1011_p11), %s1172_s3, 1024, %s192_s6, [#allocation6], %s1176_s8, %s1176_s8, %s925_s9  }
  0x2a   : > { %s1040_s15 = sadd.s32 1, %s920_s21   ;;  %s29_s16 = sadd.s32 1, %s916_s20 }
  0x2b   : > { %s26_s17 = ssub.s32 %s920_s21, %s1040_s15  ;;  %p36_p12 = scmp.ne.s32.totalorder %s916_s20, %s912_s19 }
  0x2c   : > { %p27_p13 = scmp.eq.s32.totalorder %s26_s17, 0  ;;  %p37_p0 = scmp.eq.s32.totalorder %s920_s21, 0 }
  0x2d   : > { %p1050_p5 = por %p150_p2, %p36_p12  ;;  %p715_p10 = scmp.lt.s32.totalorder %s920_s21, 2 }
  0x2e   : > { %s1056_s27 = scalar_select %p27_p13, %s916_s20, %s29_s16  }
  0x2f   : > { %s1184_s23 = scalar_select %p1050_p5, 1, 0 }
  0x30   : > { %p38_p3 = por %p37_p0, %p36_p12  ;;  %s208_s28 = sand.u32 1, %s916_s20  }
  0x31   : > { %s600_s29 = sshll.u32 %s208_s28, 3  ;;  %s631_s30 = sshll.u32 %s920_s21, 7 }
  0x32   : > { %s1063_s10 = scalar_lea.hbm %s1169_s0, %s631_s30  ;;  %s212_s11 = scalar_lea.vmem [#allocation2], %s600_s29 }
  0x33   : > { %s219_s12 = sshll.u32 %s212_s11, 4  ;;  %p1067_p2 = pnand %p715_p10, %p38_p3  ;;  %s1065_s12 = int_to_ptr.vmem [resolvable:$true] %s219_s12 }
  0x34   : > { %s1071_s14 = scalar_lea.sflag [#allocation3], %s208_s28  ;;  %s824_s16 = scalar_lea.hbm %s1063_s10, 128 }
  0x35   : > { %p825_p11 = scmp.ne.s32.totalorder %s1063_s10, %s824_s16  ;;  %p826_p7 = pneg %p1067_p2 }
  0x36   : > { %s829_s29 = scalar_lea.hbm %s1169_s0, 256  ;;  %p830_p13 = scmp.lt.s32.totalorder %s1063_s10, %s1169_s0 }
  0x37   : > { %p827_p9 = pnand %p826_p7, %p825_p11  ;;  %p831_p0 = scmp.lt.s32.totalorder %s829_s29, %s824_s16 }
  0x39   : > { %p828_p12 = pneg %p827_p9  ;;  %p832_p10 = por %p831_p0, %p830_p13 }
  0x3b   : > { %p833_p3 = pnand %p832_p10, %p828_p12 }
  0x3d   : > { %836 = shalt.err (!%p833_p3)
}
  0x3e   : > { %s837_s28 = scalar_lea.vmem %s1065_s12, 128  ;;  %s926_s11 = smov [#allocation2]  }
  0x3f   : > { %p838_p1 = scmp.ne.s32.totalorder %s1065_s12, %s837_s28  ;;  %s842_s8 = sshll.u32 %s926_s11, 4  ;;  %s843_s8 = int_to_ptr.vmem [resolvable:$false] %s842_s8 }
  0x40   : > { %s844_s17 = scalar_lea.vmem %s843_s8, 256  ;;  %p845_p9 = scmp.lt.s32.totalorder %s1065_s12, %s843_s8 }
  0x41   : > { %p840_p6 = pnand %p838_p1, %p826_p7  ;;  %p846_p5 = scmp.lt.s32.totalorder %s844_s17, %s837_s28 }
  0x43   : > { %p841_p11 = pneg %p840_p6  ;;  %p847_p4 = por %p846_p5, %p845_p9 }
  0x45   : > { %p848_p8 = pnand %p847_p4, %p841_p11 }
  0x47   : > { %851 = shalt.err (!%p848_p8)
}
  0x48   : > { %s1186_s16 = smov 64   ;;  %p1187_p1 = scmp.ne.s32.totalorder %s1182_s26, 0 }
  0x49   : > { %708 = dma.hbm_to_vmem [thread:$0]  (!%p1067_p2), %s1063_s10, 128, %s1065_s12, %s1071_s14, %s1186_s16, %s1186_s16, %s925_s9  }
  0x4a   : > { %231 = sbr.rel (%p1187_p1) target bundleno = 517 (0x205), region = 40  ;;  %s1098_s30 = sand.u32 (!%p1187_p1), 1, %s912_s19  }
  0x4b   : > { %s604_s8 = sshll.u32 (!%p1187_p1), %s1098_s30, 3  ;;  %s234_s29 = scalar_lea.sflag (!%p1187_p1), [#allocation3], %s1098_s30 }
  0x4c   : > { %s237_s13 = scalar_lea.vmem (!%p1187_p1), [#allocation2], %s604_s8  ;;  %p1188_p4 = scmp.ne.s32.totalorder (!%p1187_p1), %s1180_s24, 0 }
  0x4f   : > { %895 = dma.done.wait (%p1188_p4), %s234_s29, 128  }
  0x50   : > { %897 = vsyncadd (%p1188_p4), %s234_s29, 4294967168  ;;  %p1189_p6 = scmp.eq.s32.totalorder %s983_s22, 0 }
  0x52   : > { %899 = dma.done.wait (%p1189_p6), [#allocation6], 1536   ;;  %p1190_p8 = pmov %p1189_p6 }
  0x53   : > { %v927_v0 = vmov 0.0   ;;  %vm928_vm0 = vmmov 0   ;;  %v759_v1 = vld [vmem:[#allocation5 + $0x18] sm:$0xff]   ;;  %v760_v2 = vld [vmem:[#allocation5 + $0x10] sm:$0xff]   ;;  %v761_v4 = vld [vmem:[#allocation5 + $0x8] sm:$0xff]   ;;  %vm321_vm1 = vcmask 523264  }
  0x54   : > { %901 = vsyncadd (%p1190_p8), [#allocation6], 4294965760  ;;  %654 = vmatprep.subr.bf16.mxu0 %v927_v0  ;;  %662 = vmatprep.mubr.msk.bf16.mxu0 %vm928_vm0, %v927_v0  ;;  %v764_v3 = vld [vmem:[#allocation7 + $0x38] sm:$0xff]   ;;  %v765_v5 = vld [vmem:[#allocation7 + $0x30] sm:$0xff]   ;;  %s271_s12 = scalar_lea.vmem [#allocation8], %s604_s8  ;;  %s634_s6 = sshll.u32 %s983_s22, 7 }
  0x55   : > { %666 = vmatprep.subr.bf16.mxu1 %v927_v0  ;;  %682 = vmatprep.mubr.msk.bf16.mxu1 %vm928_vm0, %v927_v0  ;;  %v762_v6 = vld [vmem:[#allocation5] sm:$0xff]   ;;  %v766_v7 = vld [vmem:[#allocation7 + $0x28] sm:$0xff]   ;;  %v763_v8 = vld [vmem:[%s237_s13] sm:$0xff]   ;;  %s503_s14 = sshll.u32 %s271_s12, 4  ;;  %s1126_s11 = scalar_lea.hbm %s1174_s5, %s634_s6  ;;  %s1121_s14 = int_to_ptr.vmem [resolvable:$true] %s503_s14 }
  0x56   : > { %655 = vmatpush3.bf16.msra.mxu0 %v759_v1  ;;  %667 = vmatpush3.bf16.msra.mxu1 %v764_v3  ;;  %v767_v9 = vld [vmem:[#allocation7 + $0x20] sm:$0xff]   ;;  %v768_v10 = vld [vmem:[#allocation7 + $0x18] sm:$0xff]   ;;  %v769_v11 = vld [vmem:[#allocation7 + $0x10] sm:$0xff]   ;;  %s490_s17 = scalar_lea.sflag [#allocation4], %s1098_s30  ;;  %s852_s16 = scalar_lea.vmem %s1121_s14, 128 }
  0x57   : > { %656 = vmatprep.subr.bf16.mxu0 %v927_v0  ;;  %668 = vmatprep.subr.bf16.mxu1 %v927_v0  ;;  %v770_v12 = vld [vmem:[#allocation7 + $0x8] sm:$0xff]   ;;  %v771_v13 = vld [vmem:[#allocation7] sm:$0xff]   ;;  %v608_v15 = vld [vmem:[%s1171_s2] ss:$0 sm:$0xff]  ;;  %p853_p5 = scmp.ne.s32.totalorder %s1121_s14, %s852_s16  ;;  %p1191_p2 = scmp.ne.s32.totalorder %s1184_s23, 0 }
  0x58   : > { %v615_v23 = vld [vmem:[%s1173_s4] ss:$0 sm:$0xff]  ;;  %s929_s22 = smov [#allocation8]  }
  0x59   : > { %p854_p7 = pnand %p853_p5, %p1191_p2  ;;  %s856_s8 = sshll.u32 %s929_s22, 4  ;;  %s857_s8 = int_to_ptr.vmem [resolvable:$false] %s856_s8 }
  0x5a   : > { %657 = vmatpush3.bf16.msra.mxu0 %v760_v2  ;;  %669 = vmatpush3.bf16.msra.mxu1 %v765_v5  ;;  %s858_s29 = scalar_lea.vmem %s857_s8, 256  ;;  %p859_p13 = scmp.lt.s32.totalorder %s1121_s14, %s857_s8 }
  0x5b   : > { %658 = vmatprep.subr.bf16.mxu0 %v927_v0  ;;  %670 = vmatprep.subr.bf16.mxu1 %v927_v0  ;;  %p855_p12 = pneg %p854_p7  ;;  %p860_p0 = scmp.lt.s32.totalorder %s858_s29, %s852_s16 }
  0x5d   : > { %p861_p10 = por %p860_p0, %p859_p13 }
  0x5e   : > { %659 = vmatpush3.bf16.msra.mxu0 %v761_v4  ;;  %671 = vmatpush3.bf16.msra.mxu1 %v766_v7 }
  0x5f   : > { %660 = vmatprep.subr.bf16.mxu0 %v927_v0  ;;  %672 = vmatprep.subr.bf16.mxu1 %v927_v0  ;;  %p862_p3 = pnand %p861_p10, %p855_p12 }
  0x62   : > { %661 = vmatpush3.bf16.msra.mxu0 %v762_v6  ;;  %673 = vmatpush3.bf16.msra.mxu1 %v767_v9 }
  0x63   : > { %674 = vmatprep.subr.bf16.mxu1 %v927_v0 }
  0x65   : > { %663 = vmatmul.mubr.msk.bf16.vlgmr.msra.gmra.mxu0 %vm321_vm1, %v763_v8 }
  0x66   : > { %675 = vmatpush3.bf16.msra.mxu1 %v768_v10 }
  0x67   : > { %676 = vmatprep.subr.bf16.mxu1 %v927_v0 }
  0x6a   : > { %677 = vmatpush3.bf16.msra.mxu1 %v769_v11 }
  0x6b   : > { %678 = vmatprep.subr.bf16.mxu1 %v927_v0 }
  0x6e   : > { %679 = vmatpush3.bf16.msra.mxu1 %v770_v12 }
  0x6f   : > { %680 = vmatprep.subr.bf16.mxu1 %v927_v0 }
  0x72   : > { %681 = vmatpush3.bf16.msra.mxu1 %v771_v13 }
 0x125   : > { %v359_v14 = vpop.f32.mrf.mxu0 }
 0x126   : > { %v360_v18 = vadd.f32 %v608_v15, %v359_v14 }
 0x127   : > { %v664_v16 = vpop.f32.mrf.mxu0 }
 0x129   : > { %v362_v17 = vpop.f32.mrf.mxu0 }
 0x12a   : > { %v363_v19 = vadd.f32 %v608_v15, %v362_v17 }
 0x12b   : > { %v665_v20 = vpop.f32.mrf.mxu0 }
 0x12c   : > { %v366_v21 = vpack.c.bf16 %v363_v19, %v360_v18 }
 0x12e   : > { %683 = vmatmul.mubr.bf16.vlgmr.msra.gmra.mxu1 %v366_v21 }
 0x1ee   : > { %v472_v22 = vpop.f32.mrf.mxu1 }
 0x1ef   : > { %v473_v26 = vadd.f32 %v615_v23, %v472_v22 }
 0x1f0   : > { %v684_v24 = vpop.f32.mrf.mxu1 }
 0x1f2   : > { %v475_v25 = vpop.f32.mrf.mxu1 }
 0x1f3   : > { %v476_v27 = vadd.f32 %v615_v23, %v475_v25 }
 0x1f4   : > { %v685_v28 = vpop.f32.mrf.mxu1 }
 0x1f5   : > { %v638_v29 = vpack.c.bf16 %v476_v27, %v473_v26 }
 0x1f7   : > { %639 = vst [vmem:[%s271_s12] sm:$0xff] %v638_v29  }
 0x1f8   : > { %865 = shalt.err (!%p862_p3)
}
 0x1f9   : > { %s866_s13 = scalar_lea.hbm %s1126_s11, 128  ;;  %s870_s9 = scalar_lea.hbm %s1174_s5, 256 }
 0x1fa   : > { %p867_p11 = scmp.ne.s32.totalorder %s1126_s11, %s866_s13  ;;  %p871_p4 = scmp.lt.s32.totalorder %s1126_s11, %s1174_s5 }
 0x1fb   : > { %p872_p6 = scmp.lt.s32.totalorder %s870_s9, %s866_s13 }
 0x1fc   : > { %p868_p9 = pnand %p867_p11, %p1191_p2 }
 0x1fd   : > { %p873_p8 = por %p872_p6, %p871_p4 }
 0x1fe   : > { %p869_p1 = pneg %p868_p9 }
 0x200   : > { %p874_p5 = pnand %p873_p8, %p869_p1 }
 0x202   : > { %877 = shalt.err (!%p874_p5)
}
 0x203   : > { %s930_s6 = smov 64   ;;  %s931_s7 = smov 4  }
 0x204   : > { %696 = dma.vmem_to_hbm [thread:$0]  (%p1191_p2), %s1121_s14, 128, %s1126_s11, %s490_s17, %s930_s6, %s930_s6, %s931_s7  }
 0x205 PF: > { %s518_s28 = sand.u32 1, %s908_s18   ;;  %p1192_p7 = scmp.ne.s32.totalorder %s1181_s25, 0 }
 0x206   : > { %p1193_p12 = scmp.ge.s32.totalorder %s920_s21, 2  ;;  %s519_s16 = scalar_lea.sflag [#allocation4], %s518_s28 }
 0x208   : > { %p710_p13 = pnand %p1193_p12, %p1192_p7 }
 0x20a   : > { %p711_p0 = pneg %p710_p13 }
 0x20c   : > { %903 = dma.done.wait (%p711_p0), %s519_s16, 128  }
 0x20d   : > { %905 = vsyncadd (%p711_p0), %s519_s16, 4294967168  ;;  %p19_p10 = scmp.ge.s32.totalorder %s1040_s15, 4   ;;  %s1194_s18 = smov %s912_s19 }
 0x20e   : > { %s1195_s19 = smov %s916_s20  ;;  %s1196_s20 = smov %s1056_s27 }
 0x20f   : > { %s1197_s21 = smov %s1040_s15  ;;  %21 = sbr.rel (!%p19_p10) target bundleno = 6 (0x6), region = 93 }
 0x214   :  { %524 = vsyncpa [#allocation3], 1 }
 0x215   :  { %526 = vsyncpa [#allocation3 + $0x1], 1 }
 0x216   :  { %527 = vsyncpa [#allocation6], 1 }
 0x217   :  { %528 = vsyncpa [#allocation4], 1 }
 0x218   :  { %530 = vsyncpa [#allocation4 + $0x1], 1 }

</bundles_post_ra>
